<compile_context>
chip_gen: v7x
topology: tpu7x:2x2x1
jax: 0.10.0
libtpu: 0.0.40
codegen_flags: <defaults>
</compile_context>

<pallas_src>
import functools

import jax
import jax.numpy as jnp
from jax.experimental import pallas as pl
from jax.experimental.pallas import tpu as pltpu


def _round_up(v, m):
    return (v + m - 1) // m * m


def _causal_loss_kernel(x_ref, xcf_ref, mask_ref, out_ref, acc_ref, *,
                        n_rows, tm, needs_row_mask):
    i = pl.program_id(0)

    @pl.when(i == 0)
    def _init():
        acc_ref[...] = jnp.zeros_like(acc_ref)

    # Upcast right after load (free load-convert; keeps bf16 HBM traffic halved).
    diff = x_ref[...].astype(jnp.float32) - xcf_ref[...].astype(jnp.float32)
    # mask is (1, D) and already carries the 1/(N*len(dims)) scale.
    contrib = jnp.maximum(diff, 0.0) * mask_ref[...]

    if needs_row_mask:
        # Ragged last tile: rows beyond N come from a clipped DMA (undefined
        # contents). Select, don't multiply, so even NaN garbage becomes 0.
        row_ids = jax.lax.broadcasted_iota(jnp.int32, (tm, 1), 0) + i * tm
        contrib = jnp.where(row_ids < n_rows, contrib, 0.0)

    tmm, d = contrib.shape
    # Fold row groups of 8 onto the (8, D) accumulator: pure vreg-wise VPU
    # adds, no cross-lane (XLU) work in the steady state.
    acc_ref[...] += contrib.reshape(tmm // 8, 8, d).sum(axis=0)

    @pl.when(i == pl.num_programs(0) - 1)
    def _finalize():
        out_ref[0, 0] = jnp.sum(acc_ref[...])


def causal_loss(x, x_cf, monotonous_dims):
    """Pallas TPU implementation of CausalLoss.forward. Returns scalar f32."""
    assert x.ndim == 2 and x.shape == x_cf.shape
    assert len(monotonous_dims) > 0
    n, d = x.shape
    num_dims = len(monotonous_dims)

    # Keep native dtype (e.g. bf16) — do NOT pre-cast in the wrapper.
    if x_cf.dtype != x.dtype:
        x_cf = x_cf.astype(x.dtype)
    elt = jnp.dtype(x.dtype).itemsize

    # Row tile: keep 2 inputs x 2 pipeline buffers x TM x D x elt <= ~24 MiB
    # so the same config fits v7x's 64 MiB VMEM; cap at 1024 rows (v5e/v6e
    # sweet spot per measured tiled-elementwise data).
    budget = 24 * 1024 * 1024
    tm = budget // (4 * d * elt)
    tm = max(8, min(int(tm), 1024, _round_up(n, 8)))
    tm = (tm // 8) * 8
    num_tiles = pl.cdiv(n, tm)
    needs_row_mask = (n % tm) != 0

    # Scaled column mask (1, D). scatter-add so repeated dims count twice
    # (matches the PyTorch loop); columns not in dims contribute zero.
    scale = 1.0 / (n * num_dims)
    idx = jnp.asarray(monotonous_dims, dtype=jnp.int32)
    mask = jnp.zeros((d,), jnp.float32).at[idx].add(scale).reshape(1, d)

    cost = pl.CostEstimate(
        flops=3 * n * d,
        transcendentals=0,
        bytes_accessed=2 * n * d * elt + d * 4 + 4,
    )

    kernel = functools.partial(
        _causal_loss_kernel, n_rows=n, tm=tm, needs_row_mask=needs_row_mask)

    out = pl.pallas_call(
        kernel,
        out_shape=jax.ShapeDtypeStruct((1, 1), jnp.float32),
        grid_spec=pltpu.PrefetchScalarGridSpec(
            num_scalar_prefetch=0,
            grid=(num_tiles,),
            in_specs=[
                pl.BlockSpec((tm, d), lambda i: (i, 0)),
                pl.BlockSpec((tm, d), lambda i: (i, 0)),
                pl.BlockSpec((1, d), lambda i: (0, 0)),
            ],
            out_specs=pl.BlockSpec(memory_space=pltpu.SMEM),
            scratch_shapes=[pltpu.VMEM((8, d), jnp.float32)],
        ),
        compiler_params=pltpu.CompilerParams(
            dimension_semantics=("arbitrary",),
            vmem_limit_bytes=32 * 1024 * 1024,
        ),
        cost_estimate=cost,
    )(x, x_cf, mask)
    return out[0, 0]


def _reference(x, x_cf, monotonous_dims):
    # Pure-JAX reference mirroring the PyTorch loop exactly.
    loss = 0.0
    for dim in monotonous_dims:
        loss += jnp.mean(jnp.maximum(x[:, dim] - x_cf[:, dim], 0.0))
    return loss / len(monotonous_dims)


if __name__ == "__main__":
    key = jax.random.PRNGKey(0)
    k1, k2, k3, k4 = jax.random.split(key, 4)

    # Case 1: aligned f32 inputs, unique monotonous dims (single full tile).
    N, D = 8, 32
    dims = [1, 5, 12]
    x = jax.random.normal(k1, (N, D), dtype=jnp.float32)
    x_cf = jax.random.normal(k2, (N, D), dtype=jnp.float32)
    loss = causal_loss(x, x_cf, dims)
    jax.block_until_ready(loss)
    ref = _reference(x, x_cf, dims)
    assert jnp.allclose(loss, ref, atol=1e-6, rtol=1e-6), (loss, ref)

    # Case 2: unaligned rows/cols, duplicate dim, bf16 inputs streamed natively
    # (exercises the in-kernel ragged-row mask and the full-extent D block).
    N2, D2 = 10, 33
    dims2 = [0, 7, 7, 32]
    x2 = jax.random.normal(k3, (N2, D2), dtype=jnp.float32).astype(jnp.bfloat16)
    x2_cf = jax.random.normal(k4, (N2, D2), dtype=jnp.float32).astype(jnp.bfloat16)
    loss2 = causal_loss(x2, x2_cf, dims2)
    jax.block_until_ready(loss2)
    ref2 = _reference(x2.astype(jnp.float32), x2_cf.astype(jnp.float32), dims2)
    assert jnp.allclose(loss2, ref2, atol=1e-5, rtol=1e-5), (loss2, ref2)

    print("KERNEL_OK")
</pallas_src>

<mosaic_0001>
module attributes {stable_mosaic.version = 11 : i64} {
  func.func @_causal_loss_kernel(%arg0: i32, %arg1: memref<8x32xf32, #tpu.memory_space<vmem>>, %arg2: memref<8x32xf32, #tpu.memory_space<vmem>>, %arg3: memref<1x32xf32, #tpu.memory_space<vmem>>, %arg4: memref<1x1xf32, #tpu.memory_space<smem>>, %arg5: memref<8x32xf32, #tpu.memory_space<vmem>>) attributes {dimension_semantics = [#tpu.dimension_semantics<arbitrary>], iteration_bounds = array<i64: 1>, scalar_prefetch = 0 : i64, scratch_operands = 1 : i64, tpu.core_type = #tpu.core_type<tc>, window_params = [{transform_indices = @transform_0, window_bounds = array<i64: 8, 32>}, {transform_indices = @transform_1, window_bounds = array<i64: 8, 32>}, {pipeline_mode = #tpu.pipeline_mode<synchronous>, transform_indices = @transform_2, window_bounds = array<i64: 1, 32>}, {transform_indices = @transform_3, window_bounds = array<i64: 1, 1>}]} {
    %c0_i32 = arith.constant 0 : i32
    %0 = arith.cmpi eq, %arg0, %c0_i32 : i32
    %1 = arith.extui %0 : i1 to i32
    %c0_i32_0 = arith.constant 0 : i32
    %2 = arith.cmpi ne, %1, %c0_i32_0 : i32
    scf.if %2 {
      %cst_13 = arith.constant 0.000000e+00 : f32
      %19 = vector.broadcast %cst_13 : f32 to vector<8x32xf32>
      %c0_14 = arith.constant 0 : index
      %c0_15 = arith.constant 0 : index
      %20 = vector.load %arg5[%c0_14, %c0_15] : memref<8x32xf32, #tpu.memory_space<vmem>>, vector<8x32xf32>
      tpu.vector_store %arg5[%c0_14, %c0_15], %19 {strides = array<i32>} : memref<8x32xf32, #tpu.memory_space<vmem>>, vector<8x32xf32>,
    } else {
    }
    %c0 = arith.constant 0 : index
    %c0_1 = arith.constant 0 : index
    %3 = vector.load %arg1[%c0, %c0_1] : memref<8x32xf32, #tpu.memory_space<vmem>>, vector<8x32xf32>
    %c0_2 = arith.constant 0 : index
    %c0_3 = arith.constant 0 : index
    %4 = vector.load %arg2[%c0_2, %c0_3] : memref<8x32xf32, #tpu.memory_space<vmem>>, vector<8x32xf32>
    %5 = arith.subf %3, %4 : vector<8x32xf32>
    %cst = arith.constant 0.000000e+00 : f32
    %6 = vector.broadcast %cst : f32 to vector<8x32xf32>
    %7 = arith.maximumf %5, %6 : vector<8x32xf32>
    %c0_4 = arith.constant 0 : index
    %c0_5 = arith.constant 0 : index
    %8 = vector.load %arg3[%c0_4, %c0_5] : memref<1x32xf32, #tpu.memory_space<vmem>>, vector<1x32xf32>
    %9 = vector.broadcast %8 : vector<1x32xf32> to vector<8x32xf32>
    %10 = arith.mulf %7, %9 : vector<8x32xf32>
    %c0_6 = arith.constant 0 : index
    %c0_7 = arith.constant 0 : index
    %11 = vector.load %arg5[%c0_6, %c0_7] : memref<8x32xf32, #tpu.memory_space<vmem>>, vector<8x32xf32>
    %12 = vector.shape_cast %10 : vector<8x32xf32> to vector<1x8x32xf32>
    %cst_8 = arith.constant dense<0.000000e+00> : vector<8x32xf32>
    %13 = vector.multi_reduction <add>, %12, %cst_8 [0] : vector<1x8x32xf32> to vector<8x32xf32>
    %14 = arith.addf %11, %13 : vector<8x32xf32>
    %c0_9 = arith.constant 0 : index
    %c0_10 = arith.constant 0 : index
    %15 = vector.load %arg5[%c0_9, %c0_10] : memref<8x32xf32, #tpu.memory_space<vmem>>, vector<8x32xf32>
    tpu.vector_store %arg5[%c0_9, %c0_10], %14 {strides = array<i32>} : memref<8x32xf32, #tpu.memory_space<vmem>>, vector<8x32xf32>,
    %c0_i32_11 = arith.constant 0 : i32
    %16 = arith.cmpi eq, %arg0, %c0_i32_11 : i32
    %17 = arith.extui %16 : i1 to i32
    %c0_i32_12 = arith.constant 0 : i32
    %18 = arith.cmpi ne, %17, %c0_i32_12 : i32
    scf.if %18 {
      %c0_13 = arith.constant 0 : index
      %c0_14 = arith.constant 0 : index
      %19 = vector.load %arg5[%c0_13, %c0_14] : memref<8x32xf32, #tpu.memory_space<vmem>>, vector<8x32xf32>
      %20 = vector.shape_cast %19 : vector<8x32xf32> to vector<1x8x32xf32>
      %cst_15 = arith.constant dense<0.000000e+00> : vector<1xf32>
      %21 = vector.multi_reduction <add>, %20, %cst_15 [1, 2] : vector<1x8x32xf32> to vector<1xf32>
      %22 = vector.shape_cast %21 : vector<1xf32> to vector<1x1x1xf32>
      %23 = vector.extract %22[0, 0, 0] : f32 from vector<1x1x1xf32>
      %c0_16 = arith.constant 0 : index
      %c0_17 = arith.constant 0 : index
      %24 = memref.load %arg4[%c0_16, %c0_17] : memref<1x1xf32, #tpu.memory_space<smem>>
      memref.store %23, %arg4[%c0_16, %c0_17] : memref<1x1xf32, #tpu.memory_space<smem>>
    } else {
    }
    return
  }
  func.func @transform_0(%arg0: i32) -> (i32, i32) {
    %c0_i32 = arith.constant 0 : i32
    %c0_i32_0 = arith.constant 0 : i32
    return %arg0, %c0_i32 : i32, i32
  }
  func.func @transform_1(%arg0: i32) -> (i32, i32) {
    %c0_i32 = arith.constant 0 : i32
    %c0_i32_0 = arith.constant 0 : i32
    return %arg0, %c0_i32 : i32, i32
  }
  func.func @transform_2(%arg0: i32) -> (i32, i32) {
    %c0_i32 = arith.constant 0 : i32
    %c0_i32_0 = arith.constant 0 : i32
    %c0_i32_1 = arith.constant 0 : i32
    return %c0_i32, %c0_i32_0 : i32, i32
  }
  func.func @transform_3(%arg0: i32) -> (i32, i32) {
    %c0_i32 = arith.constant 0 : i32
    %c0_i32_0 = arith.constant 0 : i32
    %c0_i32_1 = arith.constant 0 : i32
    return %c0_i32, %c0_i32_0 : i32, i32
  }
}

</mosaic_0001>

<bundles_post_ra>
// kernel: tpu_custom_call.1
= control target key start
LH: loop header
LB: loop body
LE: loop exit
PB: predicated region body
PF: predicated region fallthrough
CT: control target
= control target key end

     0   :  { %8 = vsyncpa [#allocation4], 0  ;;  %s223_s0 = inlined_call_operand.hbm [shape: f32[8,32], index: 0, kind: input, shape index: {}]   ;;  %s224_s1 = inlined_call_operand.hbm [shape: f32[8,32], index: 1, kind: input, shape index: {}]   ;;  %s225_s2 = inlined_call_operand.vmem [shape: f32[1,32], index: 2, kind: input, shape index: {}]   ;;  %s226_s3 = inlined_call_operand.hbm [shape: f32[1,1], index: 3, kind: output, shape index: {}]  }
   0x1   :  { %9 = vsyncpa [#allocation7], 0 }
   0x2   :  { %10 = vsyncpa [#allocation5], 0  ;;  %s160_s12 = smov [#allocation3]   ;;  %s161_s14 = smov [#allocation6]  }
   0x3   :  { %s17_s13 = sshll.u32 %s160_s12, 4  ;;  %s27_s15 = sshll.u32 %s161_s14, 4  ;;  %s18_s13 = int_to_ptr.vmem [resolvable:$true] %s17_s13  ;;  %s28_s15 = int_to_ptr.vmem [resolvable:$true] %s27_s15 }
   0x4   :  { %s100_s18 = scalar_lea.hbm %s223_s0, 128 }
   0x5   :  { %p101_p0 = scmp.ne.s32.totalorder %s223_s0, %s100_s18  ;;  %p104_p1 = scmp.lt.u32.totalorder %s100_s18, %s223_s0 }
   0x7   :  { %p106_p2 = pnand %p104_p1, %p101_p0 }
   0x9   :  { %109 = shalt.err (!%p106_p2)
}
   0xa   :  { %s110_s23 = scalar_lea.vmem %s18_s13, 128  ;;  %p115_p4 = scmp.lt.s32.totalorder %s18_s13, %s18_s13 }
   0xb   :  { %p111_p3 = scmp.ne.s32.totalorder %s18_s13, %s110_s23  ;;  %p116_p5 = scmp.lt.s32.totalorder %s110_s23, %s110_s23 }
   0xd   :  { %p117_p6 = por %p116_p5, %p115_p4 }
   0xf   :  { %p118_p7 = pnand %p117_p6, %p111_p3 }
  0x11   :  { %121 = shalt.err (!%p118_p7)
}
  0x12   :  { %20 = dma.hbm_to_vmem [thread:$0]  %s223_s0, 128, %s18_s13, [#allocation4]  }
  0x13   :  { %s122_s28 = scalar_lea.hbm %s224_s1, 128 }
  0x14   :  { %p123_p8 = scmp.ne.s32.totalorder %s224_s1, %s122_s28  ;;  %p126_p9 = scmp.lt.u32.totalorder %s122_s28, %s224_s1 }
  0x16   :  { %p128_p10 = pnand %p126_p9, %p123_p8 }
  0x18   :  { %131 = shalt.err (!%p128_p10)
}
  0x19   :  { %s132_s6 = scalar_lea.vmem %s28_s15, 128  ;;  %p137_p12 = scmp.lt.s32.totalorder %s28_s15, %s28_s15 }
  0x1a   :  { %p133_p11 = scmp.ne.s32.totalorder %s28_s15, %s132_s6  ;;  %p138_p13 = scmp.lt.s32.totalorder %s132_s6, %s132_s6 }
  0x1c   :  { %p139_p0 = por %p138_p13, %p137_p12 }
  0x1e   :  { %p140_p1 = pnand %p139_p0, %p133_p11 }
  0x20   :  { %143 = shalt.err (!%p140_p1)
}
  0x21   :  { %30 = dma.hbm_to_vmem [thread:$0]  %s224_s1, 128, %s28_s15, [#allocation7]  }
  0x22   :  { %154 = dma.done.wait [#allocation4], 128  }
  0x23   :  { %155 = vsyncadd [#allocation4], 4294967168 }
  0x24   :  { %156 = dma.done.wait [#allocation7], 128  }
  0x25   :  { %157 = vsyncadd [#allocation7], 4294967168  ;;  %vm43_vm0 = vcmask 261120   ;;  %v162_v0 = vmov 0.0   ;;  %v45_v1 = vld [vmem:[#allocation3] sm:$0xff]  ;;  %v46_v2 = vld [vmem:[#allocation6] sm:$0xff] }
  0x26   :  { %44 = vst.msk [vmem:[#allocation2] sm:$0xff] %vm43_vm0, %v162_v0  ;;  %v47_v3 = vsub.f32 %v45_v1, %v46_v2  ;;  %v93_v4 = vld [vmem:[%s225_s2] ss:$0 sm:$0xff]  ;;  %s144_s11 = scalar_lea.hbm %s226_s3, 16 }
  0x27   :  { %p145_p2 = scmp.ne.s32.totalorder %s226_s3, %s144_s11  ;;  %p148_p3 = scmp.lt.u32.totalorder %s144_s11, %s226_s3 }
  0x28   :  { %v48_v5 = vmax.f32 %v47_v3, 0.0 }
  0x29   :  { %p150_p4 = pnand %p148_p3, %p145_p2 }
  0x2a   :  { %v56_v7 = vmul.f32 %v93_v4, %v48_v5 }
  0x2d   :  { %v57_v6 = vld [vmem:[#allocation2] sm:$0xff] }
  0x2e   :  { %v59_v8 = vadd.f32 %v57_v6, %v56_v7 }
  0x30   :  { %61 = vst.msk [vmem:[#allocation2] sm:$0xff] %vm43_vm0, %v59_v8 }
  0x37   :  { %v65_v9 = vld [vmem:[#allocation2] sm:$0xff] }
  0x38   :  { %v66_v10 = vsel %vm43_vm0, %v65_v9, 0.0 }
  0x39   :  { %67 = vadd.xlane.f32.xlu0 %v66_v10 }
  0xc6   :  { %v68_v11 = vpop.xlane.xlu0 %67 }
  0xc7   :  { %v69_v12 = vrot.slane %v68_v11, 4 }
  0xc9   :  { %v70_v13 = vadd.f32 %v69_v12, %v68_v11 }
  0xcb   :  { %v71_v14 = vrot.slane %v70_v13, 2 }
  0xcd   :  { %v72_v15 = vadd.f32 %v71_v14, %v70_v13 }
  0xcf   :  { %v73_v16 = vrot.slane %v72_v15, 1 }
  0xd1   :  { %v74_v17 = vadd.f32 %v73_v16, %v72_v15 }
  0xd3   :  { %94 = vpush %v74_v17 }
 0x104   :  { %s95_s1 = spop %94 }
 0x105   :  { %77 = sst [smem:[#allocation8]] %s95_s1 }
 0x106   :  { %153 = shalt.err (!%p150_p4)
}
 0x107   :  { %s163_s16 = smov [#allocation8]  }
 0x108   :  { %85 = dma.smem_to_hbm %s163_s16, 16, %s226_s3, [#allocation5]  }
 0x109   :  { %158 = dma.done.wait [#allocation5], 16  }
 0x10a   :  { %159 = vsyncadd [#allocation5], 4294967280 }
 0x10b   :  { %89 = sfence }
 0x10c   :  { %90 = vsyncpa [#allocation4], 1 }
 0x10d   :  { %91 = vsyncpa [#allocation7], 1 }
 0x10e   :  { %92 = vsyncpa [#allocation5], 1 }

</bundles_post_ra>
